<compile_context>
chip_gen: v6e
topology: v6e:2x2x1
jax: 0.10.0
libtpu: 0.0.40
codegen_flags: <defaults>
</compile_context>

<pallas_src>
import functools
import math

import jax
import jax.numpy as jnp
from jax.experimental import pallas as pl
from jax.experimental.pallas import tpu as pltpu


def _round_up(x, m):
    return ((x + m - 1) // m) * m


def _pick_block_b(B, T, D):
    """Pick the batch-block size BB.

    Targets 64-256 rows per step for big B, keeps >= 2 grid steps when possible
    (v7x has 2 TensorCores), multiples of 8 (sublane-dense output stores), and a
    conservative VMEM budget for the double-buffered (BB, T, D) input stream.
    """
    if B <= 8:
        return B
    bb = min(256, _round_up(pl.cdiv(B, 2), 8))
    budget = 8 * 1024 * 1024            # well under v7x's 32 MiB scoped VMEM
    per_row = 2 * T * D * 4             # double-buffered f32 input bytes per batch row
    bb = min(bb, max(8, (budget // per_row) // 8 * 8))
    return max(8, bb)


def _attn_kernel(x_ref, wqkv_ref, bqkv_ref, wout_ref, out_ref, *, H, P):
    # x_ref block: (BB, T, D) — BB batch rows per grid step.
    BB, T, D = x_ref.shape

    # Fused Q/K/V projection for the whole slab: (BB*T, D) @ (D, 3H) on the MXU.
    xr = x_ref[...].reshape(BB * T, D)
    qkv = jnp.dot(xr, wqkv_ref[...], preferred_element_type=jnp.float32) + bqkv_ref[...]
    qkv = qkv.reshape(BB, T, 3 * H)

    q = qkv[:, T - 1, 0:H]          # (BB, H)    == W_q(input[:, -1, :]) + b_q
    k = qkv[:, :, H:2 * H]          # (BB, T, H) == W_k(input) + b_k + b_in (b_in folded)
    v = qkv[:, :, 2 * H:3 * H]      # (BB, T, H) == W_v(input) + b_v

    # Additive attention: h = tanh(q + k + b_in)  (b_in already folded into k's bias).
    h = jnp.tanh(q[:, None, :] + k)                                  # (BB, T, H)

    # e = h @ W_out as a VPU multiply + lane reduction (avoids an N=1 matmul).
    # W_out's scalar bias is omitted: softmax over T is shift-invariant.
    e = jnp.sum(h * wout_ref[...].reshape(1, 1, H), axis=-1)         # (BB, T)

    # Numerically-stable softmax over time.
    e_max = jnp.max(e, axis=-1, keepdims=True)
    p = jnp.exp(e - e_max)
    s = jnp.sum(p, axis=-1, keepdims=True)
    a = p * pl.reciprocal(s)        # exact; approx=True would use the EUP at ~1e-4 rel err

    # v_out[b, h] = sum_t a[b, t] * v[b, t, h]  (small T/H: VPU mul + sublane reduce)
    v_out = jnp.sum(a[:, :, None] * v, axis=1)                       # (BB, H)

    # Lane-dense packed output slab: [ v_out | a | zero pad ] -> (BB, P), P % 128 == 0.
    parts = [v_out, a]
    if P > H + T:
        parts.append(jnp.zeros((BB, P - H - T), jnp.float32))
    out_ref[...] = jnp.concatenate(parts, axis=-1)


def final_attention_qkv_add(x, params, *, block_b=None, use_bf16=False):
    """x: (B, T, D) f32. Returns (v, a) with v: (B, H), a: (B, T)."""
    B, T, D = x.shape
    H = params["W_q"].shape[1]

    # Fuse QKV weights/biases; fold the scalar b_in into the K bias (q + k + b_in).
    W_qkv = jnp.concatenate([params["W_q"], params["W_k"], params["W_v"]], axis=1)  # (D, 3H)
    b_qkv = jnp.concatenate(
        [params["b_q"], params["b_k"] + params["b_in"][0, 0], params["b_v"]],
        axis=1,
    )                                                                               # (1, 3H)
    w_out_row = params["W_out"].reshape(1, H)                                       # (1, H)

    if use_bf16:
        # v6e/v7x: full-rate bf16 MXU, f32 accumulation via preferred_element_type.
        x = x.astype(jnp.bfloat16)
        W_qkv = W_qkv.astype(jnp.bfloat16)

    # Batch blocking (pad B up to a multiple of BB; padded rows sliced away below).
    BB = _pick_block_b(B, T, D) if block_b is None else block_b
    Bp = _round_up(B, BB)
    if Bp != B:
        x = jnp.pad(x, ((0, Bp - B), (0, 0), (0, 0)))
    nb = Bp // BB

    # Packed lane-dense output width.
    P = _round_up(H + T, 128)

    kernel = functools.partial(_attn_kernel, H=H, P=P)

    packed = pl.pallas_call(
        kernel,
        out_shape=jax.ShapeDtypeStruct((Bp, P), jnp.float32),
        grid_spec=pltpu.PrefetchScalarGridSpec(
            num_scalar_prefetch=0,
            grid=(nb,),
            in_specs=[
                pl.BlockSpec((BB, T, D), lambda b: (b, 0, 0)),   # x slab
                pl.BlockSpec((D, 3 * H), lambda b: (0, 0)),      # fused W_qkv
                pl.BlockSpec((1, 3 * H), lambda b: (0, 0)),      # fused bias
                pl.BlockSpec((1, H), lambda b: (0, 0)),          # W_out row
            ],
            out_specs=pl.BlockSpec((BB, P), lambda b: (b, 0)),   # packed [v | a | pad]
        ),
        compiler_params=pltpu.CompilerParams(
            dimension_semantics=("parallel",),
            vmem_limit_bytes=32 * 1024 * 1024,
        ),
    )(x, W_qkv, b_qkv, w_out_row)

    v_out = packed[:B, 0:H]
    a_out = packed[:B, H:H + T]
    return v_out, a_out


def init_params(key, attention_input_dim, attention_hidden_dim):
    """Deterministic init mirroring torch shapes (weights stored as (in, out))."""
    D, H = attention_input_dim, attention_hidden_dim
    ks = jax.random.split(key, 8)
    # kaiming_uniform(a=sqrt(5)) over fan_in -> bound = 1/sqrt(fan_in)
    bw = 1.0 / math.sqrt(D)
    bo = 1.0 / math.sqrt(H)
    params = {
        "W_q": jax.random.uniform(ks[0], (D, H), jnp.float32, -bw, bw),
        "b_q": jax.random.uniform(ks[1], (1, H), jnp.float32, -bw, bw),
        "W_k": jax.random.uniform(ks[2], (D, H), jnp.float32, -bw, bw),
        "b_k": jax.random.uniform(ks[3], (1, H), jnp.float32, -bw, bw),
        "W_v": jax.random.uniform(ks[4], (D, H), jnp.float32, -bw, bw),
        "b_v": jax.random.uniform(ks[5], (1, H), jnp.float32, -bw, bw),
        "W_out": jax.random.uniform(ks[6], (H, 1), jnp.float32, -bo, bo),
        "b_out": jax.random.uniform(ks[7], (1, 1), jnp.float32, -bo, bo),
        "b_in": jnp.zeros((1, 1), jnp.float32),
    }
    return params


def reference_forward(x, params):
    """Pure-JAX reference of the torch forward ('add' attention, eval-mode dropout)."""
    q = x[:, -1, :] @ params["W_q"] + params["b_q"]            # (B, H)
    k = x @ params["W_k"] + params["b_k"]                      # (B, T, H)
    v = x @ params["W_v"] + params["b_v"]                      # (B, T, H)
    h = jnp.tanh(q[:, None, :] + k + params["b_in"][0, 0])     # (B, T, H)
    e = (h @ params["W_out"])[..., 0] + params["b_out"][0, 0]  # (B, T)
    a = jax.nn.softmax(e, axis=1)
    vout = jnp.einsum("bt,bth->bh", a, v)
    return vout, a


if __name__ == "__main__":
    # Small shapes; B=12 exercises batch blocking (BB=8 -> 2 grid steps) and padding.
    B, T, D, H = 12, 8, 32, 16
    key = jax.random.PRNGKey(0)
    k_x, k_p = jax.random.split(key)

    x = jax.random.normal(k_x, (B, T, D), dtype=jnp.float32)
    params = init_params(k_p, D, H)

    v_out, a_out = final_attention_qkv_add(x, params)
    jax.block_until_ready((v_out, a_out))

    v_ref, a_ref = reference_forward(x, params)
    assert v_out.shape == (B, H) and a_out.shape == (B, T)
    assert jnp.allclose(v_out, v_ref, atol=1e-5, rtol=1e-5), "v mismatch"
    assert jnp.allclose(a_out, a_ref, atol=1e-5, rtol=1e-5), "a mismatch"

    print("KERNEL_OK")
</pallas_src>

<mosaic_0001>
module attributes {stable_mosaic.version = 11 : i64} {
  func.func @_attn_kernel(%arg0: i32, %arg1: memref<8x8x32xf32, #tpu.memory_space<vmem>>, %arg2: memref<32x48xf32, #tpu.memory_space<vmem>>, %arg3: memref<1x48xf32, #tpu.memory_space<vmem>>, %arg4: memref<1x16xf32, #tpu.memory_space<vmem>>, %arg5: memref<8x128xf32, #tpu.memory_space<vmem>>) attributes {dimension_semantics = [#tpu.dimension_semantics<parallel>], iteration_bounds = array<i64: 2>, scalar_prefetch = 0 : i64, scratch_operands = 0 : i64, tpu.core_type = #tpu.core_type<tc>, window_params = [{transform_indices = @transform_0, window_bounds = array<i64: 8, 8, 32>}, {pipeline_mode = #tpu.pipeline_mode<synchronous>, transform_indices = @transform_1, window_bounds = array<i64: 32, 48>}, {pipeline_mode = #tpu.pipeline_mode<synchronous>, transform_indices = @transform_2, window_bounds = array<i64: 1, 48>}, {pipeline_mode = #tpu.pipeline_mode<synchronous>, transform_indices = @transform_3, window_bounds = array<i64: 1, 16>}, {transform_indices = @transform_4, window_bounds = array<i64: 8, 128>}]} {
    %c0 = arith.constant 0 : index
    %c0_0 = arith.constant 0 : index
    %c0_1 = arith.constant 0 : index
    %0 = vector.load %arg1[%c0, %c0_0, %c0_1] : memref<8x8x32xf32, #tpu.memory_space<vmem>>, vector<8x8x32xf32>
    %1 = vector.shape_cast %0 : vector<8x8x32xf32> to vector<64x32xf32>
    %c0_2 = arith.constant 0 : index
    %c0_3 = arith.constant 0 : index
    %2 = vector.load %arg2[%c0_2, %c0_3] : memref<32x48xf32, #tpu.memory_space<vmem>>, vector<32x48xf32>
    %cst = arith.constant dense<0.000000e+00> : vector<64x48xf32>
    %3 = tpu.matmul %1, %2, %cst {dimension_numbers = #tpu.dot_dimension_numbers<[1], [0], [0], [1], [0, 0, 1, 1], [], []>} : vector<64x32xf32>, vector<32x48xf32>, vector<64x48xf32> -> vector<64x48xf32>
    %c0_4 = arith.constant 0 : index
    %c0_5 = arith.constant 0 : index
    %4 = vector.load %arg3[%c0_4, %c0_5] : memref<1x48xf32, #tpu.memory_space<vmem>>, vector<1x48xf32>
    %5 = vector.broadcast %4 : vector<1x48xf32> to vector<64x48xf32>
    %6 = arith.addf %3, %5 : vector<64x48xf32>
    %7 = vector.shape_cast %6 : vector<64x48xf32> to vector<8x8x48xf32>
    %8 = vector.extract_strided_slice %7 {offsets = [0, 7, 0], sizes = [8, 1, 16], strides = [1, 1, 1]} : vector<8x8x48xf32> to vector<8x1x16xf32>
    %9 = vector.shape_cast %8 : vector<8x1x16xf32> to vector<8x16xf32>
    %10 = vector.extract_strided_slice %7 {offsets = [0, 0, 16], sizes = [8, 8, 16], strides = [1, 1, 1]} : vector<8x8x48xf32> to vector<8x8x16xf32>
    %11 = vector.extract_strided_slice %7 {offsets = [0, 0, 32], sizes = [8, 8, 16], strides = [1, 1, 1]} : vector<8x8x48xf32> to vector<8x8x16xf32>
    %12 = vector.shape_cast %9 : vector<8x16xf32> to vector<8x1x16xf32>
    %13 = vector.broadcast %12 : vector<8x1x16xf32> to vector<8x8x16xf32>
    %14 = arith.addf %13, %10 : vector<8x8x16xf32>
    %15 = math.tanh %14 : vector<8x8x16xf32>
    %c0_6 = arith.constant 0 : index
    %c0_7 = arith.constant 0 : index
    %16 = vector.load %arg4[%c0_6, %c0_7] : memref<1x16xf32, #tpu.memory_space<vmem>>, vector<1x16xf32>
    %17 = vector.shape_cast %16 : vector<1x16xf32> to vector<1x1x16xf32>
    %18 = vector.broadcast %17 : vector<1x1x16xf32> to vector<8x8x16xf32>
    %19 = arith.mulf %15, %18 : vector<8x8x16xf32>
    %cst_8 = arith.constant dense<0.000000e+00> : vector<8x8xf32>
    %20 = vector.multi_reduction <add>, %19, %cst_8 [2] : vector<8x8x16xf32> to vector<8x8xf32>
    %cst_9 = arith.constant dense<0xFF800000> : vector<8xf32>
    %21 = vector.multi_reduction <maximumf>, %20, %cst_9 [1] : vector<8x8xf32> to vector<8xf32>
    %22 = vector.shape_cast %21 : vector<8xf32> to vector<8x1xf32>
    %23 = vector.broadcast %22 : vector<8x1xf32> to vector<8x8xf32>
    %24 = arith.subf %20, %23 : vector<8x8xf32>
    %25 = math.exp %24 : vector<8x8xf32>
    %cst_10 = arith.constant dense<0.000000e+00> : vector<8xf32>
    %26 = vector.multi_reduction <add>, %25, %cst_10 [1] : vector<8x8xf32> to vector<8xf32>
    %27 = vector.shape_cast %26 : vector<8xf32> to vector<8x1xf32>
    %28 = tpu.reciprocal %27 : vector<8x1xf32> -> vector<8x1xf32>
    %29 = vector.broadcast %28 : vector<8x1xf32> to vector<8x8xf32>
    %30 = arith.mulf %25, %29 : vector<8x8xf32>
    %31 = vector.shape_cast %30 : vector<8x8xf32> to vector<8x8x1xf32>
    %32 = vector.broadcast %31 : vector<8x8x1xf32> to vector<8x8x16xf32>
    %33 = arith.mulf %32, %11 : vector<8x8x16xf32>
    %cst_11 = arith.constant dense<0.000000e+00> : vector<8x16xf32>
    %34 = vector.multi_reduction <add>, %33, %cst_11 [1] : vector<8x8x16xf32> to vector<8x16xf32>
    %cst_12 = arith.constant 0.000000e+00 : f32
    %35 = vector.broadcast %cst_12 : f32 to vector<8x104xf32>
    %36 = tpu.concatenate %34, %30, %35 in 1 : vector<8x16xf32>, vector<8x8xf32>, vector<8x104xf32> -> vector<8x128xf32>
    %c0_13 = arith.constant 0 : index
    %c0_14 = arith.constant 0 : index
    %37 = vector.load %arg5[%c0_13, %c0_14] : memref<8x128xf32, #tpu.memory_space<vmem>>, vector<8x128xf32>
    tpu.vector_store %arg5[%c0_13, %c0_14], %36 {strides = array<i32>} : memref<8x128xf32, #tpu.memory_space<vmem>>, vector<8x128xf32>,
    return
  }
  func.func @transform_0(%arg0: i32) -> (i32, i32, i32) {
    %c0_i32 = arith.constant 0 : i32
    %c0_i32_0 = arith.constant 0 : i32
    %c0_i32_1 = arith.constant 0 : i32
    return %arg0, %c0_i32, %c0_i32_0 : i32, i32, i32
  }
  func.func @transform_1(%arg0: i32) -> (i32, i32) {
    %c0_i32 = arith.constant 0 : i32
    %c0_i32_0 = arith.constant 0 : i32
    %c0_i32_1 = arith.constant 0 : i32
    return %c0_i32, %c0_i32_0 : i32, i32
  }
  func.func @transform_2(%arg0: i32) -> (i32, i32) {
    %c0_i32 = arith.constant 0 : i32
    %c0_i32_0 = arith.constant 0 : i32
    %c0_i32_1 = arith.constant 0 : i32
    return %c0_i32, %c0_i32_0 : i32, i32
  }
  func.func @transform_3(%arg0: i32) -> (i32, i32) {
    %c0_i32 = arith.constant 0 : i32
    %c0_i32_0 = arith.constant 0 : i32
    %c0_i32_1 = arith.constant 0 : i32
    return %c0_i32, %c0_i32_0 : i32, i32
  }
  func.func @transform_4(%arg0: i32) -> (i32, i32) {
    %c0_i32 = arith.constant 0 : i32
    %c0_i32_0 = arith.constant 0 : i32
    return %arg0, %c0_i32 : i32, i32
  }
}

</mosaic_0001>

<bundles_post_ra>
// kernel: tpu_custom_call.1
= control target key start
LH: loop header
LB: loop body
LE: loop exit
PB: predicated region body
PF: predicated region fallthrough
CT: control target
= control target key end

     0   :  { %9 = vsyncpa [#allocation3], 0  ;;  %s1708_s0 = inlined_call_operand.hbm [shape: f32[16,8,32], index: 0, kind: input, shape index: {}]   ;;  %s1709_s1 = inlined_call_operand.hbm [shape: f32[32,48], index: 1, kind: input, shape index: {}]   ;;  %s1710_s2 = inlined_call_operand.vmem [shape: f32[1,48], index: 2, kind: input, shape index: {}]   ;;  %s1711_s3 = inlined_call_operand.vmem [shape: f32[1,16], index: 3, kind: input, shape index: {}]   ;;  %s1712_s4 = inlined_call_operand.hbm [shape: f32[16,128], index: 4, kind: output, shape index: {}]  }
   0x1   :  { %11 = vsyncpa [#allocation3 + $0x1], 0 }
   0x2   :  { %12 = vsyncpa [#allocation6], 0 }
   0x3   :  { %13 = vsyncpa [#allocation4], 0 }
   0x4   :  { %15 = vsyncpa [#allocation4 + $0x1], 0  ;;  %s1335_s15 = smov 0   ;;  %s1337_s16 = smov 0  }
   0x5   :  { %s1339_s17 = smov 0   ;;  %s1341_s18 = smov 0  }
   0x6 LB: > { %s1356_s19 = sadd.s32 4294967295, %s1300_s18   ;;  %s1014_s20 = sadd.s32 4294967294, %s1300_s18   ;;  %s1300_s18 = sphi %s1341_s18, %s1734_s18   ;;  %s1296_s17 = sphi %s1339_s17, %s1733_s17   ;;  %s1292_s16 = sphi %s1337_s16, %s1732_s16   ;;  %s1288_s15 = sphi %s1335_s15, %s1731_s15  }
   0x7   : > { %p41_p0 = scmp.ne.s32.totalorder %s1292_s16, %s1288_s15  ;;  %p1713_p1 = scmp.eq.s32.totalorder %s1356_s19, 0 }
   0x8   : > { %p134_p3 = scmp.eq.s32.totalorder %s1014_s20, 1  ;;  %p1015_p5 = scmp.ge.s32.totalorder %s1300_s18, 1 }
   0x9   : > { %p1365_p4 = por %p1713_p1, %p41_p0  ;;  %p141_p7 = scmp.lt.s32.totalorder %s1300_s18, 3 }
   0xa   : > { %p1370_p6 = por %p134_p3, %p41_p0  ;;  %s1302_s24 = smov [#allocation5]  }
   0xb   : > { %s1717_s21 = scalar_select %p1365_p4, 1, 0 }
   0xc   : > { %s1718_s22 = scalar_select %p1370_p6, 1, 0 }
   0xd   : > { %p1375_p8 = pnand %p1015_p5, %p141_p7  ;;  %s153_s25 = sshll.u32 %s1302_s24, 4  ;;  %s154_s25 = int_to_ptr.vmem [resolvable:$true] %s153_s25 }
   0xe   : > { %s1389_s27 = sadd.s32 1, %s1300_s18   ;;  %s28_s28 = sadd.s32 1, %s1296_s17 }
   0xf   : > { %s1719_s23 = scalar_select %p1375_p8, 1, 0 }
  0x10   : > { %p1088_p9 = pneg %p1375_p8  ;;  %s25_s29 = ssub.s32 %s1300_s18, %s1389_s27 }
  0x11   : > { %s1189_s30 = scalar_lea.vmem %s154_s25, 512  ;;  %p1197_p5 = scmp.lt.s32.totalorder %s154_s25, %s154_s25 }
  0x12   : > { %p1384_p11 = pnand %p1088_p9, %p1713_p1  ;;  %p1190_p13 = scmp.ne.s32.totalorder %s154_s25, %s1189_s30 }
  0x13   : > { %p1198_p7 = scmp.lt.s32.totalorder %s1189_s30, %s1189_s30 }
  0x14   : > { %p1180_p12 = pneg %p1384_p11 }
  0x15   : > { %p1199_p10 = por %p1198_p7, %p1197_p5 }
  0x16   : > { %p1192_p0 = pnand %p1190_p13, %p1180_p12 }
  0x18   : > { %p1193_p3 = pneg %p1192_p0 }
  0x1a   : > { %p1200_p2 = pnand %p1199_p10, %p1193_p3 }
  0x1c   : > { %1203 = shalt.err (!%p1200_p2)
}
  0x1d   : > { %s1303_s5 = smov 128   ;;  %s1304_s6 = smov 8  }
  0x1e   : > { %1091 = dma.hbm_to_vmem [thread:$0]  (!%p1384_p11), %s1709_s1, 512, %s154_s25, [#allocation6], %s1303_s5, %s1303_s5, %s1304_s6  }
  0x1f   : > { %p26_p2 = scmp.eq.s32.totalorder %s25_s29, 0  ;;  %p35_p9 = scmp.ne.s32.totalorder %s1296_s17, %s1292_s16 }
  0x20   : > { %p36_p10 = scmp.eq.s32.totalorder %s1300_s18, 0  ;;  %p1101_p12 = scmp.lt.s32.totalorder %s1300_s18, 2 }
  0x21   : > { %s1409_s9 = scalar_select %p26_p2, %s1296_s17, %s28_s28  }
  0x22   : > { %p37_p13 = por %p36_p10, %p35_p9  ;;  %p1721_p0 = scmp.eq.s32.totalorder %s1356_s19, 1 }
  0x23   : > { %s173_s11 = sand.u32 1, %s1296_s17   ;;  %s1039_s12 = sshll.u32 %s1300_s18, 10 }
  0x24   : > { %p1413_p3 = por %p1721_p0, %p35_p9  ;;  %s1018_s13 = sshll.u32 %s173_s11, 6 }
  0x25   : > { %s1422_s24 = scalar_lea.hbm %s1708_s0, %s1039_s12  ;;  %s177_s25 = scalar_lea.vmem [#allocation2], %s1018_s13 }
  0x26   : > { %s1722_s10 = scalar_select %p1413_p3, 1, 0 }
  0x27   : > { %s184_s26 = sshll.u32 %s177_s25, 4  ;;  %p1424_p11 = pnand %p1101_p12, %p37_p13  ;;  %s1428_s26 = int_to_ptr.vmem [resolvable:$true] %s184_s26 }
  0x28   : > { %s1430_s29 = scalar_lea.sflag [#allocation3], %s173_s11  ;;  %s1204_s30 = scalar_lea.hbm %s1422_s24, 1024 }
  0x29   : > { %p1205_p5 = scmp.ne.s32.totalorder %s1422_s24, %s1204_s30  ;;  %p1206_p7 = pneg %p1424_p11 }
  0x2a   : > { %s1209_s12 = scalar_lea.hbm %s1708_s0, 2048  ;;  %p1210_p10 = scmp.lt.s32.totalorder %s1422_s24, %s1708_s0 }
  0x2b   : > { %p1207_p2 = pnand %p1206_p7, %p1205_p5  ;;  %p1211_p12 = scmp.lt.s32.totalorder %s1209_s12, %s1204_s30 }
  0x2d   : > { %p1208_p9 = pneg %p1207_p2  ;;  %p1212_p13 = por %p1211_p12, %p1210_p10 }
  0x2f   : > { %p1213_p0 = pnand %p1212_p13, %p1208_p9 }
  0x31   : > { %1216 = shalt.err (!%p1213_p0)
}
  0x32   : > { %s1217_s11 = scalar_lea.vmem %s1428_s26, 1024  ;;  %s1305_s20 = smov [#allocation2]  }
  0x33   : > { %p1218_p1 = scmp.ne.s32.totalorder %s1428_s26, %s1217_s11  ;;  %s1222_s25 = sshll.u32 %s1305_s20, 4  ;;  %s1223_s25 = int_to_ptr.vmem [resolvable:$false] %s1222_s25 }
  0x34   : > { %s1224_s7 = scalar_lea.vmem %s1223_s25, 2048  ;;  %p1225_p2 = scmp.lt.s32.totalorder %s1428_s26, %s1223_s25 }
  0x35   : > { %p1220_p6 = pnand %p1218_p1, %p1206_p7  ;;  %p1226_p3 = scmp.lt.s32.totalorder %s1224_s7, %s1217_s11 }
  0x37   : > { %p1221_p5 = pneg %p1220_p6  ;;  %p1227_p4 = por %p1226_p3, %p1225_p2 }
  0x39   : > { %p1228_p8 = pnand %p1227_p4, %p1221_p5 }
  0x3b   : > { %1231 = shalt.err (!%p1228_p8)
}
  0x3c   : > { %1095 = dma.hbm_to_vmem [thread:$0]  (!%p1424_p11), %s1422_s24, 1024, %s1428_s26, %s1430_s29, %s1303_s5, %s1303_s5, %s1304_s6  }
  0x3d   : > { %p1724_p1 = scmp.ne.s32.totalorder %s1719_s23, 0 }
  0x3e   : > { %s1457_s30 = sand.u32 (!%p1724_p1), 1, %s1292_s16   ;;  %p1725_p4 = scmp.ne.s32.totalorder (!%p1724_p1), %s1717_s21, 0 }
  0x3f   : > { %196 = sbr.rel (%p1724_p1) target bundleno = 1338 (0x53a), region = 36  ;;  %s1022_s8 = sshll.u32 (!%p1724_p1), %s1457_s30, 6 }
  0x40   : > { %s199_s12 = scalar_lea.sflag (!%p1724_p1), [#allocation3], %s1457_s30  ;;  %s1461_s13 = scalar_lea.vmem (!%p1724_p1), [#allocation2], %s1022_s8 }
  0x44   : > { %1275 = dma.done.wait (%p1725_p4), %s199_s12, 1024  }
  0x45   : > { %1277 = vsyncadd (%p1725_p4), %s199_s12, 4294966272  ;;  %p1726_p6 = scmp.eq.s32.totalorder %s1356_s19, 0 }
  0x47   : > { %1279 = dma.done.wait (%p1726_p6), [#allocation6], 512   ;;  %p1727_p8 = pmov %p1726_p6 }
  0x48   : > { %v243_v0 = vld [vmem:[#allocation5 + $0x18] sm:$0xff]  ;;  %v242_v1 = vld [vmem:[#allocation5 + $0x10] sm:$0xff]  ;;  %vm251_vm0 = vcmask 261120   ;;  %v232_v2 = vld [vmem:[%s1461_s13] sm:$0xff]  ;;  %s1306_s5 = smov 112   ;;  %v381_v29 = vlaneseq  ;;  %vm476_vm1 = vcmask 130048  }
  0x49   : > { %1281 = vsyncadd (%p1727_p8), [#allocation6], 4294966784  ;;  %1052 = vmatprep.subr.mxu0 %v243_v0  ;;  %1072 = vmatprep.subr.mxu1 %v243_v0  ;;  %v241_v3 = vld [vmem:[#allocation5 + $0x8] sm:$0xff]  ;;  %v240_v4 = vld [vmem:[#allocation5] sm:$0xff]  ;;  %vm543_vm2 = vcmask 1041409   ;;  %vm545_vm3 = vcmask 1042434  }
  0x4a   : > { %1053 = vmatpush3.msra.mxu0 %v243_v0  ;;  %1076 = vmatpush3.msra.mxu1 %v243_v0  ;;  %v233_v5 = vld [vmem:[%s1461_s13 + $0x8] sm:$0xff]  ;;  %v234_v6 = vld [vmem:[%s1461_s13 + $0x10] sm:$0xff]  ;;  %v236_v7 = vld [vmem:[%s1461_s13 + $0x20] sm:$0xff]  ;;  %v1515_v30 = vshrl.u32 %v381_v29, 7  ;;  %vm547_vm4 = vcmask 1043459   ;;  %vm549_vm5 = vcmask 1044484  }
  0x4b   : > { %1054 = vmatprep.subr.mxu0 %v242_v1  ;;  %1060 = vmatprep.mubr.msk.f32.mxu0 %vm251_vm0, %v232_v2  ;;  %v237_v8 = vld [vmem:[%s1461_s13 + $0x28] sm:$0xff]  ;;  %v238_v9 = vld [vmem:[%s1461_s13 + $0x30] sm:$0xff]  ;;  %v235_v10 = vld [vmem:[%s1461_s13 + $0x18] sm:$0xff]  ;;  %vm551_vm6 = vcmask 1045509   ;;  %vm553_vm7 = vcmask 1046534   ;;  %vm555_vm8 = vcmask 1047559  }
  0x4c   : > { %1055 = vmatpush3.msra.mxu0 %v242_v1  ;;  %1073 = vmatprep.subr.mxu1 %v242_v1  ;;  %v239_v11 = vld [vmem:[%s1461_s13 + $0x38] sm:$0xff]  ;;  %v1025_v12 = vld [vmem:[%s1710_s2] ss:$0 sm:$0xff]  ;;  %v1518_v31 = vsub.s32 7, %v1515_v30  ;;  %vm558_vm9 = vcmask 64512   ;;  %vm800_vm10 = vcmask 392448  }
  0x4d   : > { %1056 = vmatprep.subr.mxu0 %v241_v3  ;;  %1077 = vmatpush3.msra.mxu1 %v242_v1  ;;  %v1034_v53 = vld [vmem:[%s1711_s3] ss:$0 sm:$0xff]  ;;  %s1308_s26 = smov 96   ;;  %s1024_s28 = sshll.u32 %s1457_s30, 3  ;;  %vm917_vm11 = vcmask 195584  }
  0x4e   : > { %1057 = vmatpush3.msra.mxu0 %v241_v3  ;;  %1074 = vmatprep.subr.mxu1 %v241_v3  ;;  %s1036_s29 = sshll.u32 %s1356_s19, 7  ;;  %s230_s14 = scalar_lea.vmem [#allocation7], %s1024_s28 }
  0x4f   : > { %1058 = vmatprep.subr.mxu0 %v240_v4  ;;  %1078 = vmatpush3.msra.mxu1 %v241_v3  ;;  %s934_s11 = sshll.u32 %s230_s14, 4  ;;  %s1671_s7 = scalar_lea.hbm %s1712_s4, %s1036_s29  ;;  %s935_s11 = int_to_ptr.vmem [resolvable:$true] %s934_s11 }
  0x50   : > { %1059 = vmatpush3.msra.mxu0 %v240_v4  ;;  %1075 = vmatprep.subr.mxu1 %v240_v4  ;;  %s921_s8 = scalar_lea.sflag [#allocation4], %s1457_s30  ;;  %s1232_s12 = scalar_lea.vmem %s935_s11, 128 }
  0x51   : > { %1061 = vmatmul.mubr.msk.f32.vlgmr.msra.gmra.mxu0 %vm251_vm0, %v233_v5  ;;  %1079 = vmatpush3.msra.mxu1 %v240_v4  ;;  %p1233_p3 = scmp.ne.s32.totalorder %s935_s11, %s1232_s12  ;;  %p1728_p11 = scmp.ne.s32.totalorder %s1722_s10, 0 }
  0x52   : > { %1063 = vmatprep.mubr.msk.f32.mxu0 %vm251_vm0, %v234_v6  ;;  %1066 = vmatprep.mubr.msk.f32.mxu1 %vm251_vm0, %v236_v7  ;;  %s1309_s19 = smov [#allocation7]  }
  0x53   : > { %1067 = vmatmul.mubr.msk.f32.vlgmr.msra.gmra.mxu1 %vm251_vm0, %v237_v8  ;;  %p1234_p7 = pnand %p1233_p3, %p1728_p11  ;;  %s1236_s13 = sshll.u32 %s1309_s19, 4  ;;  %s1237_s13 = int_to_ptr.vmem [resolvable:$false] %s1236_s13 }
  0x54   : > { %1069 = vmatprep.mubr.msk.f32.mxu1 %vm251_vm0, %v238_v9  ;;  %s1238_s21 = scalar_lea.vmem %s1237_s13, 256  ;;  %p1239_p10 = scmp.lt.s32.totalorder %s935_s11, %s1237_s13 }
  0x55   : > { %1064 = vmatmul.mubr.msk.f32.gmra.mxu0 %vm251_vm0, %v235_v10  ;;  %p1235_p9 = pneg %p1234_p7  ;;  %p1240_p12 = scmp.lt.s32.totalorder %s1238_s21, %s1232_s12 }
  0x57   : > { %1070 = vmatmul.mubr.msk.f32.gmra.mxu1 %vm251_vm0, %v239_v11  ;;  %p1241_p13 = por %p1240_p12, %p1239_p10 }
  0x59   : > { %p1242_p0 = pnand %p1241_p13, %p1235_p9 }
 0x111   : > { %v1062_v13 = vpop.f32.mrf.mxu0 }
 0x112   : > { %v1490_v14 = vadd.f32 %v1062_v13, %v1025_v12 }
 0x113   : > { %v342_v15 = vpop.f32.mrf.mxu0  ;;  %v1068_v16 = vpop.f32.mrf.mxu1 }
 0x114   : > { %423 = vrot.lane.b32.xlu0 %v1490_v14, %s1306_s5  ;;  %v1493_v19 = vadd.f32 %v1025_v12, %v342_v15  ;;  %v1503_v26 = vadd.f32 %v1068_v16, %v1025_v12  ;;  %v388_v32 = vrot.slane %v1490_v14, %v1518_v31 }
 0x115   : > { %v1065_v17 = vpop.f32.mrf.mxu0  ;;  %v362_v18 = vpop.f32.mrf.mxu1 }
 0x116   : > { %v1495_v20 = vadd.f32 %v1065_v17, %v1025_v12  ;;  %v1501_v24 = vadd.f32 %v1025_v12, %v362_v18  ;;  %v384_v36 = vrot.slane %v1493_v19, %v1518_v31  ;;  %v404_v47 = vrot.slane %v1503_v26, %v1518_v31 }
 0x117   : > { %v352_v21 = vpop.f32.mrf.mxu0  ;;  %v1071_v22 = vpop.f32.mrf.mxu1  ;;  %v1548_v18 = vand.u32 127, %v381_v29 }
 0x118   : > { %427 = vrot.lane.b32.xlu1 %v1495_v20, %s1306_s5  ;;  %421 = vrot.lane.b32.xlu0 %v1493_v19, %s1306_s5  ;;  %v1499_v23 = vadd.f32 %v1025_v12, %v352_v21  ;;  %v1509_v28 = vadd.f32 %v1071_v22, %v1025_v12  ;;  %v396_v35 = vrot.slane %v1495_v20, %v1518_v31 }
 0x119   : > { %v372_v25 = vpop.f32.mrf.mxu1  ;;  %v400_v42 = vrot.slane %v1501_v24, %v1518_v31 }
 0x11a   : > { %v1507_v27 = vadd.f32 %v1025_v12, %v372_v25  ;;  %v392_v41 = vrot.slane %v1499_v23, %v1518_v31  ;;  %v412_v54 = vrot.slane %v1509_v28, %v1518_v31  ;;  %v1552_v25 = vsub.s32 %v1548_v18, %v1515_v30 }
 0x11c   : > { %425 = vrot.lane.b32.xlu1 %v1499_v23, %s1306_s5  ;;  %429 = vrot.lane.b32.xlu0 %v1501_v24, %s1306_s5  ;;  %v408_v48 = vrot.slane %v1507_v27, %v1518_v31 }
 0x120   : > { %431 = vrot.lane.b32.xlu1 %v1503_v26, %s1306_s5  ;;  %433 = vrot.lane.b32.xlu0 %v1507_v27, %s1306_s5 }
 0x124   : > { %435 = vrot.lane.b32.xlu1 %v1509_v28, %s1306_s5 }
 0x186   : > { %v424_v33 = vpop.permute.xlu0 %423 }
 0x187   : > { %v446_v34 = vadd.f32 %v424_v33, %v388_v32 }
 0x189   : > { %1144 = vtanh.f32 %v446_v34 }
 0x18a   : > { %v428_v37 = vpop.permute.xlu1 %427  ;;  %v422_v38 = vpop.permute.xlu0 %421 }
 0x18b   : > { %v448_v39 = vadd.f32 %v428_v37, %v396_v35  ;;  %v445_v40 = vadd.f32 %v422_v38, %v384_v36 }
 0x18d   : > { %1146 = vtanh.f32 %v448_v39 }
 0x18e   : > { %1148 = vtanh.f32 %v445_v40  ;;  %v426_v43 = vpop.permute.xlu1 %425  ;;  %v430_v44 = vpop.permute.xlu0 %429 }
 0x18f   : > { %v447_v45 = vadd.f32 %v426_v43, %v392_v41  ;;  %v449_v46 = vadd.f32 %v430_v44, %v400_v42 }
 0x191   : > { %1150 = vtanh.f32 %v447_v45 }
 0x192   : > { %1152 = vtanh.f32 %v449_v46  ;;  %v432_v49 = vpop.permute.xlu1 %431  ;;  %v434_v50 = vpop.permute.xlu0 %433 }
 0x193   : > { %v450_v51 = vadd.f32 %v432_v49, %v404_v47  ;;  %v451_v52 = vadd.f32 %v434_v50, %v408_v48 }
 0x195   : > { %1154 = vtanh.f32 %v450_v51 }
 0x196   : > { %v1145_v55 = vpop.eup %1144  ;;  %1156 = vtanh.f32 %v451_v52  ;;  %v436_v56 = vpop.permute.xlu1 %435 }
 0x197   : > { %v452_v57 = vadd.f32 %v436_v56, %v412_v54  ;;  %v469_v58 = vmul.f32 %v1145_v55, %v1034_v53  ;;  %v565_v54 = vsub.s32 0, %v1515_v30  ;;  %v569_v55 = vsub.s32 1, %v1515_v30 }
 0x198   : > { %v573_v56 = vsub.s32 2, %v1515_v30 }
 0x199   : > { %v480_v59 = vsel %vm476_vm1, %v469_v58, 0.0  ;;  %1158 = vtanh.f32 %v452_v57  ;;  %v577_v57 = vsub.s32 3, %v1515_v30 }
 0x19a   : > { %v1147_v60 = vpop.eup %1146  ;;  %481 = vadd.xlane.f32.xlu1 %v480_v59 }
 0x19b   : > { %v1149_v61 = vpop.eup %1148  ;;  %v471_v1 = vmul.f32 %v1147_v60, %v1034_v53 }
 0x19c   : > { %v468_v62 = vmul.f32 %v1149_v61, %v1034_v53 }
 0x19d   : > { %v486_v6 = vsel %vm476_vm1, %v471_v1, 0.0 }
 0x19e   : > { %v1151_v63 = vpop.eup %1150  ;;  %v477_v0 = vsel %vm476_vm1, %v468_v62, 0.0 }
 0x19f   : > { %v1153_v2 = vpop.eup %1152  ;;  %478 = vadd.xlane.f32.xlu0 %v477_v0  ;;  %v470_v7 = vmul.f32 %v1151_v63, %v1034_v53  ;;  %v581_v0 = vsub.s32 4, %v1515_v30 }
 0x1a0   : > { %v472_v3 = vmul.f32 %v1153_v2, %v1034_v53 }
 0x1a1   : > { %v483_v11 = vsel %vm476_vm1, %v470_v7, 0.0 }
 0x1a2   : > { %v1155_v4 = vpop.eup %1154  ;;  %v489_v5 = vsel %vm476_vm1, %v472_v3, 0.0 }
 0x1a3   : > { %v1157_v8 = vpop.eup %1156  ;;  %490 = vadd.xlane.f32.xlu1 %v489_v5  ;;  %487 = vadd.xlane.f32.xlu0 %v486_v6  ;;  %v473_v12 = vmul.f32 %v1155_v4, %v1034_v53  ;;  %v585_v5 = vsub.s32 5, %v1515_v30 }
 0x1a4   : > { %v474_v9 = vmul.f32 %v1157_v8, %v1034_v53 }
 0x1a5   : > { %v492_v15 = vsel %vm476_vm1, %v473_v12, 0.0 }
 0x1a6   : > { %v495_v10 = vsel %vm476_vm1, %v474_v9, 0.0  ;;  %v1159_v13 = vpop.eup %1158  ;;  %v589_v9 = vsub.s32 6, %v1515_v30 }
 0x1a7   : > { %496 = vadd.xlane.f32.xlu1 %v495_v10  ;;  %484 = vadd.xlane.f32.xlu0 %v483_v11  ;;  %v475_v16 = vmul.f32 %v1159_v13, %v1034_v53  ;;  %v1307_v53 = vmov 0  }
 0x1a8   : > { %1143 = vset.pattern.permute.xlu1 %v1307_v53  ;;  %1142 = vset.pattern.permute.xlu0 %v1307_v53 }
 0x1a9   : > { %v498_v17 = vsel %vm476_vm1, %v475_v16, 0.0 }
 0x1ab   : > { %493 = vadd.xlane.f32.xlu0 %v492_v15 }
 0x1af   : > { %499 = vadd.xlane.f32.xlu0 %v498_v17 }
 0x223   : > { %v482_v22 = vpop.xlane.xlu1 %481 }
 0x224   : > { %v518_v35 = vrot.slane %v482_v22, %v1552_v25 }
 0x228   : > { %v479_v21 = vpop.xlane.xlu0 %478 }
 0x229   : > { %v514_v33 = vrot.slane %v479_v21, %v1552_v25 }
 0x22b   : > { %v544_v29 = vsel %vm543_vm2, %v518_v35, %v514_v33 }
 0x22c   : > { %v488_v32 = vpop.xlane.xlu0 %487  ;;  %v491_v34 = vpop.xlane.xlu1 %490 }
 0x22d   : > { %v526_v38 = vrot.slane %v488_v32, %v1552_v25  ;;  %v530_v39 = vrot.slane %v491_v34, %v1552_v25 }
 0x230   : > { %v485_v36 = vpop.xlane.xlu0 %484  ;;  %v497_v43 = vpop.xlane.xlu1 %496 }
 0x231   : > { %v522_v37 = vrot.slane %v485_v36, %v1552_v25  ;;  %v538_v47 = vrot.slane %v497_v43, %v1552_v25 }
 0x233   : > { %v546_v40 = vsel %vm545_vm3, %v522_v37, %v544_v29 }
 0x234   : > { %v548_v41 = vsel %vm547_vm4, %v526_v38, %v546_v40  ;;  %v494_v42 = vpop.xlane.xlu0 %493 }
 0x235   : > { %v534_v44 = vrot.slane %v494_v42, %v1552_v25  ;;  %v550_v45 = vsel %vm549_vm5, %v530_v39, %v548_v41 }
 0x237   : > { %v552_v46 = vsel %vm551_vm6, %v534_v44, %v550_v45 }
 0x238   : > { %v500_v48 = vpop.xlane.xlu0 %499  ;;  %v554_v50 = vsel %vm553_vm7, %v538_v47, %v552_v46 }
 0x239   : > { %v542_v49 = vrot.slane %v500_v48, %v1552_v25 }
 0x23b   : > { %v556_v51 = vsel %vm555_vm8, %v542_v49, %v554_v50 }
 0x23c   : > { %v559_v52 = vsel %vm558_vm9, %v556_v51, -inf }
 0x23d   : > { %560 = vmax.xlane.f32.xlu1 %v559_v52 }
 0x2c6   : > { %v561_v58 = vpop.xlane.xlu1 %560 }
 0x2c7   : > { %v566_v59 = vrot.slane %v561_v58, %v565_v54  ;;  %v570_v60 = vrot.slane %v561_v58, %v569_v55  ;;  %v574_v61 = vrot.slane %v561_v58, %v573_v56  ;;  %v578_v1 = vrot.slane %v561_v58, %v577_v57 }
 0x2c8   : > { %v582_v6 = vrot.slane %v561_v58, %v581_v0  ;;  %v586_v10 = vrot.slane %v561_v58, %v585_v5  ;;  %v590_v13 = vrot.slane %v561_v58, %v589_v9 }
 0x2c9   : > { %v603_v62 = vsub.f32 %v479_v21, %v566_v59  ;;  %v604_v63 = vsub.f32 %v482_v22, %v570_v60  ;;  %v605_v2 = vsub.f32 %v485_v36, %v574_v61  ;;  %v606_v7 = vsub.f32 %v488_v32, %v578_v1 }
 0x2ca   : > { %v607_v11 = vsub.f32 %v491_v34, %v582_v6  ;;  %v608_v15 = vsub.f32 %v494_v42, %v586_v10  ;;  %v594_v21 = vrot.slane %v561_v58, %v1518_v31  ;;  %v609_v22 = vsub.f32 %v497_v43, %v590_v13 }
 0x2cb   : > { %v611_v3 = vmul.f32 1.442695, %v603_v62  ;;  %v613_v4 = vmul.f32 1.442695, %v604_v63  ;;  %v615_v8 = vmul.f32 1.442695, %v605_v2 }
 0x2cc   : > { %v617_v12 = vmul.f32 1.442695, %v606_v7  ;;  %v619_v16 = vmul.f32 1.442695, %v607_v11  ;;  %v621_v32 = vmul.f32 1.442695, %v608_v15  ;;  %v610_v35 = vsub.f32 %v500_v48, %v594_v21 }
 0x2cd   : > { %1160 = vpow2.f32 %v611_v3  ;;  %v623_v34 = vmul.f32 1.442695, %v609_v22 }
 0x2ce   : > { %1162 = vpow2.f32 %v613_v4  ;;  %v625_v37 = vmul.f32 1.442695, %v610_v35 }
 0x2cf   : > { %1164 = vpow2.f32 %v615_v8 }
 0x2d0   : > { %1166 = vpow2.f32 %v617_v12 }
 0x2d1   : > { %1168 = vpow2.f32 %v619_v16 }
 0x2d2   : > { %1170 = vpow2.f32 %v621_v32 }
 0x2d3   : > { %1172 = vpow2.f32 %v623_v34  ;;  %v875_v34 = vadd.s32 4294967280, %v1548_v18 }
 0x2d4   : > { %1174 = vpow2.f32 %v625_v37 }
 0x2da   : > { %v1161_v17 = vpop.eup %1160 }
 0x2db   : > { %v1163_v33 = vpop.eup %1162  ;;  %636 = vperm.xlu0 %1142, %v1161_v17  }
 0x2dc   : > { %639 = vperm.xlu1 %1143, %v1163_v33   ;;  %v1165_v36 = vpop.eup %1164 }
 0x2dd   : > { %v1167_v29 = vpop.eup %1166 }
 0x2de   : > { %v1169_v38 = vpop.eup %1168 }
 0x2df   : > { %v1171_v39 = vpop.eup %1170 }
 0x2e0   : > { %642 = vperm.xlu1 %1143, %v1165_v36   ;;  %v1173_v40 = vpop.eup %1172 }
 0x2e1   : > { %v1175_v41 = vpop.eup %1174 }
 0x2e4   : > { %645 = vperm.xlu1 %1143, %v1167_v29  }
 0x2e8   : > { %648 = vperm.xlu1 %1143, %v1169_v38  }
 0x2ec   : > { %651 = vperm.xlu1 %1143, %v1171_v39  }
 0x2f0   : > { %654 = vperm.xlu1 %1143, %v1173_v40  }
 0x2f4   : > { %657 = vperm.xlu1 %1143, %v1175_v41  }
 0x356   : > { %v637_v46 = vpop.permute.xlu0 %636 }
 0x357   : > { %v640_v42 = vpop.permute.xlu1 %639  ;;  %v662_v49 = vrot.slane %v637_v46, %v1552_v25 }
 0x358   : > { %v666_v48 = vrot.slane %v640_v42, %v1552_v25 }
 0x35a   : > { %v691_v58 = vsel %vm543_vm2, %v666_v48, %v662_v49 }
 0x35b   : > { %v643_v43 = vpop.permute.xlu1 %642 }
 0x35c   : > { %v670_v50 = vrot.slane %v643_v43, %v1552_v25 }
 0x35e   : > { %v692_v60 = vsel %vm545_vm3, %v670_v50, %v691_v58 }
 0x35f   : > { %v646_v44 = vpop.permute.xlu1 %645 }
 0x360   : > { %v674_v51 = vrot.slane %v646_v44, %v1552_v25 }
 0x362   : > { %v693_v62 = vsel %vm547_vm4, %v674_v51, %v692_v60 }
 0x363   : > { %v649_v45 = vpop.permute.xlu1 %648 }
 0x364   : > { %v678_v52 = vrot.slane %v649_v45, %v1552_v25 }
 0x366   : > { %v694_v63 = vsel %vm549_vm5, %v678_v52, %v693_v62 }
 0x367   : > { %v652_v47 = vpop.permute.xlu1 %651 }
 0x368   : > { %v682_v59 = vrot.slane %v652_v47, %v1552_v25 }
 0x36a   : > { %v695_v2 = vsel %vm551_vm6, %v682_v59, %v694_v63 }
 0x36b   : > { %v655_v53 = vpop.permute.xlu1 %654 }
 0x36c   : > { %v686_v61 = vrot.slane %v655_v53, %v1552_v25 }
 0x36e   : > { %v696_v4 = vsel %vm553_vm7, %v686_v61, %v695_v2 }
 0x36f   : > { %v658_v1 = vpop.permute.xlu1 %657 }
 0x370   : > { %v690_v3 = vrot.slane %v658_v1, %v1552_v25 }
 0x372   : > { %v697_v6 = vsel %vm555_vm8, %v690_v3, %v696_v4 }
 0x373   : > { %v699_v7 = vsel %vm558_vm9, %v697_v6, 0.0 }
 0x374   : > { %700 = vadd.xlane.f32.xlu1 %v699_v7 }
 0x3fd   : > { %v701_v8 = vpop.xlane.xlu1 %700 }
 0x3fe   : > { %1176 = vrcp.f32 %v701_v8 }
 0x40b   : > { %v1177_v10 = vpop.eup %1176 }
 0x40c   : > { %v707_v11 = vrot.slane %v1177_v10, %v565_v54  ;;  %v711_v13 = vrot.slane %v1177_v10, %v569_v55  ;;  %v715_v25 = vrot.slane %v1177_v10, %v573_v56  ;;  %v719_v21 = vrot.slane %v1177_v10, %v577_v57 }
 0x40d   : > { %v723_v32 = vrot.slane %v1177_v10, %v581_v0  ;;  %v727_v55 = vrot.slane %v1177_v10, %v585_v5  ;;  %v731_v56 = vrot.slane %v1177_v10, %v589_v9  ;;  %v735_v35 = vrot.slane %v1177_v10, %v1518_v31 }
 0x40e   : > { %v744_v12 = vmul.f32 %v1161_v17, %v707_v11  ;;  %v745_v15 = vmul.f32 %v1163_v33, %v711_v13  ;;  %v746_v16 = vmul.f32 %v1165_v36, %v715_v25  ;;  %v747_v22 = vmul.f32 %v1167_v29, %v719_v21 }
 0x40f   : > { %v748_v54 = vmul.f32 %v1169_v38, %v723_v32  ;;  %v749_v17 = vmul.f32 %v1171_v39, %v727_v55  ;;  %v750_v33 = vmul.f32 %v1173_v40, %v731_v56  ;;  %v751_v57 = vmul.f32 %v1175_v41, %v735_v35 }
 0x410   : > { %754 = vperm.xlu0 %1142, %v744_v12   ;;  %v1625_v36 = vsub.s32 %v875_v34, %v1515_v30 }
 0x414   : > { %759 = vperm.xlu0 %1142, %v745_v15  }
 0x418   : > { %764 = vperm.xlu0 %1142, %v746_v16  }
 0x41c   : > { %769 = vperm.xlu0 %1142, %v747_v22  }
 0x420   : > { %774 = vperm.xlu0 %1142, %v748_v54  }
 0x424   : > { %779 = vperm.xlu0 %1142, %v749_v17  }
 0x428   : > { %784 = vperm.xlu0 %1142, %v750_v33  }
 0x42c   : > { %789 = vperm.xlu0 %1142, %v751_v57  }
 0x48b   : > { %v755_v0 = vpop.permute.xlu0 %754 }
 0x48c   : > { %v879_v5 = vrot.slane %v755_v0, %v1625_v36  ;;  %v792_v31 = vmul.f32 %v755_v0, %v1493_v19 }
 0x48e   : > { %v801_v44 = vsel %vm800_vm10, %v792_v31, 0.0 }
 0x48f   : > { %v760_v37 = vpop.permute.xlu0 %759  ;;  %v802_v48 = vrot.slane %v801_v44, 4 }
 0x490   : > { %v883_v29 = vrot.slane %v760_v37, %v1625_v36  ;;  %v793_v9 = vmul.f32 %v760_v37, %v1490_v14 }
 0x491   : > { %v803_v60 = vadd.f32 %v802_v48, %v801_v44 }
 0x492   : > { %v908_v38 = vsel %vm543_vm2, %v883_v29, %v879_v5  ;;  %v808_v30 = vsel %vm800_vm10, %v793_v9, 0.0 }
 0x493   : > { %v765_v39 = vpop.permute.xlu0 %764  ;;  %v809_v46 = vrot.slane %v808_v30, 4  ;;  %v804_v8 = vrot.slane %v803_v60, 2 }
 0x494   : > { %v794_v40 = vmul.f32 %v765_v39, %v1499_v23  ;;  %v887_v18 = vrot.slane %v765_v39, %v1625_v36 }
 0x495   : > { %v810_v53 = vadd.f32 %v809_v46, %v808_v30  ;;  %v805_v54 = vadd.f32 %v804_v8, %v803_v60 }
 0x496   : > { %v909_v41 = vsel %vm545_vm3, %v887_v18, %v908_v38  ;;  %v815_v42 = vsel %vm800_vm10, %v794_v40, 0.0 }
 0x497   : > { %v770_v43 = vpop.permute.xlu0 %769  ;;  %v816_v19 = vrot.slane %v815_v42, 4  ;;  %v811_v3 = vrot.slane %v810_v53, 2  ;;  %v806_v29 = vrot.slane %v805_v54, 1 }
 0x498   : > { %v795_v14 = vmul.f32 %v770_v43, %v1495_v20  ;;  %v891_v45 = vrot.slane %v770_v43, %v1625_v36 }
 0x499   : > { %v817_v58 = vadd.f32 %v816_v19, %v815_v42  ;;  %v812_v16 = vadd.f32 %v811_v3, %v810_v53  ;;  %v807_v43 = vadd.f32 %v806_v29, %v805_v54 }
 0x49a   : > { %v822_v23 = vsel %vm800_vm10, %v795_v14, 0.0  ;;  %v910_v47 = vsel %vm547_vm4, %v891_v45, %v909_v41 }
 0x49b   : > { %v823_v49 = vrot.slane %v822_v23, 4  ;;  %v775_v50 = vpop.permute.xlu0 %774  ;;  %v818_v6 = vrot.slane %v817_v58, 2  ;;  %v813_v34 = vrot.slane %v812_v16, 1 }
 0x49c   : > { %v796_v51 = vmul.f32 %v775_v50, %v1501_v24  ;;  %v895_v52 = vrot.slane %v775_v50, %v1625_v36 }
 0x49d   : > { %v824_v61 = vadd.f32 %v823_v49, %v822_v23  ;;  %v819_v21 = vadd.f32 %v818_v6, %v817_v58  ;;  %v814_v40 = vadd.f32 %v813_v34, %v812_v16 }
 0x49e   : > { %v829_v59 = vsel %vm800_vm10, %v796_v51, 0.0  ;;  %v911_v20 = vsel %vm549_vm5, %v895_v52, %v910_v47 }
 0x49f   : > { %v830_v62 = vrot.slane %v829_v59, 4  ;;  %v780_v63 = vpop.permute.xlu0 %779  ;;  %v825_v10 = vrot.slane %v824_v61, 2  ;;  %v820_v37 = vrot.slane %v819_v21, 1  ;;  %v865_v46 = vsel %vm543_vm2, %v814_v40, %v807_v43 }
 0x4a0   : > { %v797_v1 = vmul.f32 %v780_v63, %v1503_v26  ;;  %v899_v2 = vrot.slane %v780_v63, %v1625_v36 }
 0x4a1   : > { %v831_v4 = vadd.f32 %v830_v62, %v829_v59  ;;  %v826_v55 = vadd.f32 %v825_v10, %v824_v61  ;;  %v821_v42 = vadd.f32 %v820_v37, %v819_v21 }
 0x4a2   : > { %v836_v24 = vsel %vm800_vm10, %v797_v1, 0.0  ;;  %v912_v7 = vsel %vm551_vm6, %v899_v2, %v911_v20 }
 0x4a3   : > { %v837_v11 = vrot.slane %v836_v24, 4  ;;  %v785_v12 = vpop.permute.xlu0 %784  ;;  %v832_v13 = vrot.slane %v831_v4, 2  ;;  %v827_v9 = vrot.slane %v826_v55, 1  ;;  %v866_v48 = vsel %vm545_vm3, %v821_v42, %v865_v46 }
 0x4a4   : > { %v798_v15 = vmul.f32 %v785_v12, %v1507_v27  ;;  %v903_v25 = vrot.slane %v785_v12, %v1625_v36 }
 0x4a5   : > { %v838_v26 = vadd.f32 %v837_v11, %v836_v24  ;;  %v833_v35 = vadd.f32 %v832_v13, %v831_v4  ;;  %v828_v44 = vadd.f32 %v827_v9, %v826_v55 }
 0x4a6   : > { %v843_v22 = vsel %vm800_vm10, %v798_v15, 0.0  ;;  %v913_v32 = vsel %vm553_vm7, %v903_v25, %v912_v7 }
 0x4a7   : > { %v839_v17 = vrot.slane %v838_v26, 2  ;;  %v844_v56 = vrot.slane %v843_v22, 4  ;;  %v790_v33 = vpop.permute.xlu0 %789  ;;  %v834_v31 = vrot.slane %v833_v35, 1  ;;  %v867_v50 = vsel %vm547_vm4, %v828_v44, %v866_v48 }
 0x4a8   : > { %v799_v57 = vmul.f32 %v790_v33, %v1509_v28  ;;  %v907_v20 = vrot.slane %v790_v33, %v1625_v36 }
 0x4a9   : > { %v840_v0 = vadd.f32 %v839_v17, %v838_v26  ;;  %v845_v27 = vadd.f32 %v844_v56, %v843_v22  ;;  %v835_v45 = vadd.f32 %v834_v31, %v833_v35 }
 0x4aa   : > { %v850_v5 = vsel %vm800_vm10, %v799_v57, 0.0  ;;  %v914_v61 = vsel %vm555_vm8, %v907_v20, %v913_v32 }
 0x4ab   : > { %v846_v38 = vrot.slane %v845_v27, 2  ;;  %v851_v39 = vrot.slane %v850_v5, 4  ;;  %v841_v18 = vrot.slane %v840_v0, 1  ;;  %v868_v51 = vsel %vm549_vm5, %v835_v45, %v867_v50 }
 0x4ad   : > { %v847_v30 = vadd.f32 %v846_v38, %v845_v27  ;;  %v852_v41 = vadd.f32 %v851_v39, %v850_v5  ;;  %v842_v19 = vadd.f32 %v841_v18, %v840_v0 }
 0x4af   : > { %v848_v14 = vrot.slane %v847_v30, 1  ;;  %v853_v28 = vrot.slane %v852_v41, 2  ;;  %v869_v53 = vsel %vm551_vm6, %v842_v19, %v868_v51 }
 0x4b1   : > { %v854_v23 = vadd.f32 %v853_v28, %v852_v41  ;;  %v849_v47 = vadd.f32 %v848_v14, %v847_v30 }
 0x4b3   : > { %v855_v49 = vrot.slane %v854_v23, 1  ;;  %v870_v58 = vsel %vm553_vm7, %v849_v47, %v869_v53 }
 0x4b5   : > { %v856_v52 = vadd.f32 %v855_v49, %v854_v23 }
 0x4b7   : > { %v871_v59 = vsel %vm555_vm8, %v856_v52, %v870_v58 }
 0x4b8   : > { %872 = vrot.lane.b32.xlu0 %v871_v59, %s1308_s26 }
 0x52a   : > { %v873_v60 = vpop.permute.xlu0 %872 }
 0x52b   : > { %v916_v62 = vsel %vm476_vm1, %v873_v60, %v914_v61 }
 0x52c   : > { %v918_v63 = vsel %vm917_vm11, %v916_v62, 0.0 }
 0x52d   : > { %919 = vst [vmem:[%s230_s14] sm:$0xff] %v918_v63 }
 0x52e   : > { %1245 = shalt.err (!%p1242_p0)
}
 0x52f   : > { %s1246_s23 = scalar_lea.hbm %s1671_s7, 128  ;;  %s1250_s6 = scalar_lea.hbm %s1712_s4, 256 }
 0x530   : > { %p1247_p5 = scmp.ne.s32.totalorder %s1671_s7, %s1246_s23  ;;  %p1251_p4 = scmp.lt.s32.totalorder %s1671_s7, %s1712_s4 }
 0x531   : > { %p1252_p6 = scmp.lt.s32.totalorder %s1250_s6, %s1246_s23 }
 0x532   : > { %p1248_p2 = pnand %p1247_p5, %p1728_p11 }
 0x533   : > { %p1253_p8 = por %p1252_p6, %p1251_p4 }
 0x534   : > { %p1249_p1 = pneg %p1248_p2 }
 0x536   : > { %p1254_p3 = pnand %p1253_p8, %p1249_p1 }
 0x538   : > { %1257 = shalt.err (!%p1254_p3)
}
 0x539   : > { %1086 = dma.vmem_to_hbm [thread:$0]  (%p1728_p11), %s935_s11, 128, %s1671_s7, %s921_s8  }
 0x53a PF: > { %s946_s28 = sand.u32 1, %s1288_s15   ;;  %p1729_p7 = scmp.ne.s32.totalorder %s1718_s22, 0 }
 0x53b   : > { %p1730_p9 = scmp.ge.s32.totalorder %s1300_s18, 2  ;;  %s947_s29 = scalar_lea.sflag [#allocation4], %s946_s28 }
 0x53d   : > { %p1097_p10 = pnand %p1730_p9, %p1729_p7 }
 0x53f   : > { %p1098_p12 = pneg %p1097_p10 }
 0x541   : > { %1283 = dma.done.wait (%p1098_p12), %s947_s29, 128  }
 0x542   : > { %1285 = vsyncadd (%p1098_p12), %s947_s29, 4294967168  ;;  %p18_p13 = scmp.ge.s32.totalorder %s1389_s27, 4   ;;  %s1731_s15 = smov %s1292_s16 }
 0x543   : > { %s1732_s16 = smov %s1296_s17  ;;  %s1733_s17 = smov %s1409_s9 }
 0x544   : > { %s1734_s18 = smov %s1389_s27  ;;  %20 = sbr.rel (!%p18_p13) target bundleno = 6 (0x6), region = 85 }
 0x549   :  { %952 = vsyncpa [#allocation3], 1 }
 0x54a   :  { %954 = vsyncpa [#allocation3 + $0x1], 1 }
 0x54b   :  { %955 = vsyncpa [#allocation6], 1 }
 0x54c   :  { %956 = vsyncpa [#allocation4], 1 }
 0x54d   :  { %958 = vsyncpa [#allocation4 + $0x1], 1 }

</bundles_post_ra>
